<compile_context>
chip_gen: v6e
topology: v6e:2x2x1
jax: 0.10.0
libtpu: 0.0.40
codegen_flags: <defaults>
</compile_context>

<pallas_src>
import jax
import jax.numpy as jnp
from jax.experimental import pallas as pl
from jax.experimental.pallas import tpu as pltpu


# Per-buffer block size target (bytes).  2 MiB * (in + out) * double-buffering
# = 8 MiB, safe under the default scoped-VMEM limit on v5e/v6e/v7x.
_TARGET_BLOCK_BYTES = 2 * 1024 * 1024
_LANE_CANDIDATES = (1024, 512, 256, 128)


def _round_up(a, m):
    return ((a + m - 1) // m) * m


def _swish_kernel(beta_ref, x_ref, o_ref):
    # beta_ref: SMEM f32[1] (scalar-prefetched); x_ref/o_ref: (row_block, lane).
    beta = beta_ref[0]
    x = x_ref[...].astype(jnp.float32)          # f32 math (v5e has no bf16 VPU/EUP)
    z = beta * x
    # sigmoid(z) = 0.5 * (tanh(z/2) + 1): one EUP transcendental, no VALU divide.
    sig = 0.5 * (jnp.tanh(0.5 * z) + 1.0)
    o_ref[...] = (x * sig).astype(o_ref.dtype)


def swish(x, beta):
    """Swish forward: x * sigmoid(beta * x).  x: any shape, beta: scalar."""
    orig_shape = x.shape
    orig_dtype = x.dtype
    n = x.size
    itemsize = jnp.dtype(orig_dtype).itemsize

    # Widest lane-dense minor dim that makes the reshape copy-free.
    lane = None
    for cand in _LANE_CANDIDATES:
        if n % cand == 0:
            lane = cand
            break

    x_flat = jnp.ravel(x)
    pad = 0
    if lane is None:
        # Rare ragged case (n not a multiple of 128): pad the flat vector.
        # swish(0) == 0 and the padded tail is sliced off, so this is safe.
        lane = 128
        pad = (-n) % lane
        x_flat = jnp.pad(x_flat, (0, pad))
    rows = (n + pad) // lane
    x2d = jnp.reshape(x_flat, (rows, lane))

    # Row-block selection: multiple of 8 (or the full dim when tiny), sized so
    # blocks are ~_TARGET_BLOCK_BYTES but the grid still has >= ~8 steps so the
    # DMA pipeline overlaps and both v7x TensorCores get work.
    if rows <= 8:
        row_block = rows                     # full-dim block (allowed by tiling rules)
    else:
        max_rows = max(8, (_TARGET_BLOCK_BYTES // (lane * itemsize)) // 8 * 8)
        target = _round_up(pl.cdiv(rows, 8), 8)
        row_block = max(8, min(max_rows, target))

    grid = (pl.cdiv(rows, row_block),)       # ragged last block is masked by Pallas

    beta_smem = jnp.reshape(jnp.asarray(beta, dtype=jnp.float32), (1,))

    out2d = pl.pallas_call(
        _swish_kernel,
        out_shape=jax.ShapeDtypeStruct((rows, lane), orig_dtype),
        grid_spec=pltpu.PrefetchScalarGridSpec(
            num_scalar_prefetch=1,           # beta -> SMEM, passed to index_maps too
            grid=grid,
            in_specs=[
                pl.BlockSpec((row_block, lane), lambda i, beta_ref: (i, 0)),
            ],
            out_specs=pl.BlockSpec((row_block, lane), lambda i, beta_ref: (i, 0)),
        ),
        compiler_params=pltpu.CompilerParams(
            dimension_semantics=("parallel",),   # shards across the 2 TCs on v7x
        ),
    )(beta_smem, x2d)

    out_flat = jnp.reshape(out2d, (-1,))
    if pad:
        out_flat = out_flat[:n]
    return jnp.reshape(out_flat, orig_shape)


def swish_reference(x, beta):
    # Pure-JAX reference matching the PyTorch module: x * sigmoid(beta * x).
    return x * jax.nn.sigmoid(beta * x)


if __name__ == "__main__":
    key = jax.random.PRNGKey(0)
    x = jax.random.normal(key, (2, 4, 16, 16), dtype=jnp.float32)

    # Deterministic parameter init, as in Swish.__init__: beta = ones(())
    beta = jnp.ones((), dtype=jnp.float32)

    out = swish(x, beta)
    out = jax.block_until_ready(out)

    ref = swish_reference(x, beta)
    assert out.shape == x.shape
    assert jnp.allclose(out, ref, atol=1e-5, rtol=1e-5), "mismatch vs reference"

    print("KERNEL_OK")
</pallas_src>

<mosaic_0001>
module attributes {stable_mosaic.version = 11 : i64} {
  func.func @_swish_kernel(%arg0: i32, %arg1: memref<1xf32, #tpu.memory_space<smem>>, %arg2: memref<2x1024xf32, #tpu.memory_space<vmem>>, %arg3: memref<2x1024xf32, #tpu.memory_space<vmem>>) attributes {dimension_semantics = [#tpu.dimension_semantics<parallel>], iteration_bounds = array<i64: 1>, scalar_prefetch = 1 : i64, scratch_operands = 0 : i64, tpu.core_type = #tpu.core_type<tc>, window_params = [{transform_indices = @transform_0, window_bounds = array<i64: 2, 1024>}, {transform_indices = @transform_1, window_bounds = array<i64: 2, 1024>}]} {
    %c0 = arith.constant 0 : index
    %0 = memref.load %arg1[%c0] : memref<1xf32, #tpu.memory_space<smem>>
    %c0_0 = arith.constant 0 : index
    %c0_1 = arith.constant 0 : index
    %1 = vector.load %arg2[%c0_0, %c0_1] : memref<2x1024xf32, #tpu.memory_space<vmem>>, vector<2x1024xf32>
    %2 = vector.broadcast %0 : f32 to vector<2x1024xf32>
    %3 = arith.mulf %2, %1 : vector<2x1024xf32>
    %cst = arith.constant 5.000000e-01 : f32
    %4 = vector.broadcast %cst : f32 to vector<2x1024xf32>
    %5 = arith.mulf %4, %3 : vector<2x1024xf32>
    %6 = math.tanh %5 : vector<2x1024xf32>
    %cst_2 = arith.constant 1.000000e+00 : f32
    %7 = vector.broadcast %cst_2 : f32 to vector<2x1024xf32>
    %8 = arith.addf %6, %7 : vector<2x1024xf32>
    %cst_3 = arith.constant 5.000000e-01 : f32
    %9 = vector.broadcast %cst_3 : f32 to vector<2x1024xf32>
    %10 = arith.mulf %9, %8 : vector<2x1024xf32>
    %11 = arith.mulf %1, %10 : vector<2x1024xf32>
    %c0_4 = arith.constant 0 : index
    %c0_5 = arith.constant 0 : index
    %12 = vector.load %arg3[%c0_4, %c0_5] : memref<2x1024xf32, #tpu.memory_space<vmem>>, vector<2x1024xf32>
    tpu.vector_store %arg3[%c0_4, %c0_5], %11 {strides = array<i32>} : memref<2x1024xf32, #tpu.memory_space<vmem>>, vector<2x1024xf32>,
    return
  }
  func.func @transform_0(%arg0: i32, %arg1: memref<1xf32, #tpu.memory_space<smem>>) -> (i32, i32) {
    %c0_i32 = arith.constant 0 : i32
    %c0_i32_0 = arith.constant 0 : i32
    return %arg0, %c0_i32 : i32, i32
  }
  func.func @transform_1(%arg0: i32, %arg1: memref<1xf32, #tpu.memory_space<smem>>) -> (i32, i32) {
    %c0_i32 = arith.constant 0 : i32
    %c0_i32_0 = arith.constant 0 : i32
    return %arg0, %c0_i32 : i32, i32
  }
}

</mosaic_0001>

<bundles_post_ra>
// kernel: tpu_custom_call.1
= control target key start
LH: loop header
LB: loop body
LE: loop exit
PB: predicated region body
PF: predicated region fallthrough
CT: control target
= control target key end

     0   :  { %8 = vsyncpa [#allocation5], 0  ;;  %s132_s0 = inlined_call_operand.<no memory space> [shape: f32[1], index: 0, kind: input, shape index: {}]   ;;  %s133_s1 = inlined_call_operand.hbm [shape: f32[2,1024], index: 1, kind: input, shape index: {}]   ;;  %s134_s2 = inlined_call_operand.hbm [shape: f32[2,1024], index: 2, kind: output, shape index: {}]  }
   0x1   :  { %9 = vsyncpa [#allocation6], 0  ;;  %s106_s9 = smov [#allocation4]  }
   0x2   :  { %s16_s10 = sshll.u32 %s106_s9, 4  ;;  %s17_s10 = int_to_ptr.vmem [resolvable:$true] %s16_s10 }
   0x3   :  { %s70_s11 = scalar_lea.vmem %s17_s10, 256  ;;  %p75_p1 = scmp.lt.s32.totalorder %s17_s10, %s17_s10 }
   0x4   :  { %p71_p0 = scmp.ne.s32.totalorder %s17_s10, %s70_s11  ;;  %p76_p2 = scmp.lt.s32.totalorder %s70_s11, %s70_s11 }
   0x6   :  { %p77_p3 = por %p76_p2, %p75_p1 }
   0x8   :  { %p78_p4 = pnand %p77_p3, %p71_p0 }
   0xa   :  { %81 = shalt.err (!%p78_p4)
}
   0xb   :  { %19 = dma.hbm_to_vmem [thread:$0]  %s133_s1, 256, %s17_s10, [#allocation5]  }
   0xc   :  { %102 = dma.done.wait [#allocation5], 256  }
   0xd   :  { %103 = vsyncadd [#allocation5], 4294967040  ;;  %v26_v0 = vstv %s132_s0  ;;  %v24_v1 = vld [vmem:[#allocation4] sm:$0xff]  ;;  %v25_v2 = vld [vmem:[#allocation4 + $0x8] sm:$0xff]  ;;  %s107_s1 = smov [#allocation7]  }
   0xe   :  { %v27_v3 = vmul.f32 %v26_v0, %v24_v1  ;;  %v28_v4 = vmul.f32 %v26_v0, %v25_v2  ;;  %s47_s16 = sshll.u32 %s107_s1, 4  ;;  %s48_s16 = int_to_ptr.vmem [resolvable:$true] %s47_s16 }
   0xf   :  { %s82_s0 = scalar_lea.vmem %s48_s16, 256  ;;  %p87_p6 = scmp.lt.s32.totalorder %s48_s16, %s48_s16 }
  0x10   :  { %v29_v5 = vmul.f32 0.5, %v27_v3  ;;  %v30_v6 = vmul.f32 0.5, %v28_v4  ;;  %p83_p5 = scmp.ne.s32.totalorder %s48_s16, %s82_s0  ;;  %p88_p7 = scmp.lt.s32.totalorder %s82_s0, %s82_s0 }
  0x12   :  { %58 = vtanh.f32 %v29_v5  ;;  %p89_p8 = por %p88_p7, %p87_p6 }
  0x13   :  { %60 = vtanh.f32 %v30_v6 }
  0x14   :  { %p90_p9 = pnand %p89_p8, %p83_p5 }
  0x1f   :  { %v59_v7 = vpop.eup %58 }
  0x20   :  { %v61_v8 = vpop.eup %60  ;;  %v33_v9 = vadd.f32 1.0, %v59_v7 }
  0x21   :  { %v34_v10 = vadd.f32 1.0, %v61_v8 }
  0x22   :  { %v35_v11 = vmul.f32 0.5, %v33_v9 }
  0x23   :  { %v36_v12 = vmul.f32 0.5, %v34_v10 }
  0x24   :  { %v37_v13 = vmul.f32 %v35_v11, %v24_v1 }
  0x25   :  { %v38_v14 = vmul.f32 %v36_v12, %v25_v2 }
  0x26   :  { %39 = vst [vmem:[#allocation7] sm:$0xff] %v37_v13 }
  0x27   :  { %40 = vst [vmem:[#allocation7 + $0x8] sm:$0xff] %v38_v14 }
  0x28   :  { %93 = shalt.err (!%p90_p9)
}
  0x29   :  { %50 = dma.vmem_to_hbm [thread:$0]  %s48_s16, 256, %s134_s2, [#allocation6]  }
  0x2a   :  { %104 = dma.done.wait [#allocation6], 256  }
  0x2b   :  { %105 = vsyncadd [#allocation6], 4294967040 }
  0x2c   :  { %54 = vsyncpa [#allocation5], 1 }
  0x2d   :  { %55 = vsyncpa [#allocation6], 1 }

</bundles_post_ra>
